<compile_context>
chip_gen: v7x
topology: tpu7x:2x2x1
jax: 0.10.0
libtpu: 0.0.40
codegen_flags: <defaults>
</compile_context>

<pallas_src>
import jax
import jax.numpy as jnp
from jax.experimental import pallas as pl
from jax.experimental.pallas import tpu as pltpu


def _resolve_shape(total, shape):
    """Resolve a torch-style view shape (may contain a single -1)."""
    shape = list(shape)
    if -1 in shape:
        idx = shape.index(-1)
        known = 1
        for i, s in enumerate(shape):
            if i != idx:
                known *= s
        assert known > 0 and total % known == 0, "view shape incompatible with input size"
        shape[idx] = total // known
    prod = 1
    for s in shape:
        prod *= s
    assert prod == total, "view shape incompatible with input size"
    return tuple(shape)


def _pick_chunks(total, itemsize, max_chunks=8, min_chunk_bytes=1 << 20):
    """Split the flat copy into up to `max_chunks` even chunks of >= 1 MiB each
    so several DMA engines can stream concurrently; small arrays use 1 DMA."""
    nbytes = total * itemsize
    n = max_chunks
    while n > 1 and (total % n != 0 or nbytes // n < min_chunk_bytes):
        n //= 2
    return max(n, 1)


def _make_dma_view_kernel(n_chunks):
    def kernel(x_hbm, o_hbm, sem):
        # Pure data movement: direct HBM -> HBM DMAs, no VMEM staging.
        copies = [
            pltpu.make_async_copy(x_hbm.at[i], o_hbm.at[i], sem.at[i])
            for i in range(n_chunks)
        ]
        for cp in copies:   # issue all chunks (concurrent DMA engines)
            cp.start()
        for cp in copies:   # then drain
            cp.wait()
    return kernel


def pallas_view(x, shape, use_kernel=True):
    """Equivalent of x.view(shape) for a contiguous tensor.

    use_kernel=True  : HBM->HBM DMA copy through a Pallas kernel (new buffer).
    use_kernel=False : metadata-only reshape (the real "view": zero bytes moved).
    """
    total = int(x.size)
    out_shape = _resolve_shape(total, shape)

    if not use_kernel:
        # A contiguous view is metadata-only; nothing can beat not copying.
        return x.reshape(out_shape)

    itemsize = jnp.dtype(x.dtype).itemsize
    n_chunks = _pick_chunks(total, itemsize)
    chunk_len = total // n_chunks

    # Row-major contiguous input -> this flatten is metadata-only.
    x2d = x.reshape(n_chunks, chunk_len)

    copied = pl.pallas_call(
        _make_dma_view_kernel(n_chunks),
        out_shape=jax.ShapeDtypeStruct((n_chunks, chunk_len), x.dtype),
        in_specs=[pl.BlockSpec(memory_space=pl.ANY)],   # raw HBM ref, no auto-DMA
        out_specs=pl.BlockSpec(memory_space=pl.ANY),
        scratch_shapes=[pltpu.SemaphoreType.DMA((n_chunks,))],
        cost_estimate=pl.CostEstimate(
            flops=0,
            transcendentals=0,
            bytes_accessed=2 * total * itemsize,  # purely memory-bound
        ),
    )(x2d)

    # Zero-cost metadata reshape to the requested view shape.
    return copied.reshape(out_shape)


if __name__ == "__main__":
    key = jax.random.PRNGKey(0)

    # Primary case from the module: NCHW input, View((2, -1)).
    x = jax.random.normal(key, (2, 4, 16, 16), dtype=jnp.float32)
    out = jax.block_until_ready(pallas_view(x, (2, -1)))
    ref = x.reshape(2, -1)
    assert out.shape == ref.shape and out.dtype == ref.dtype
    assert bool(jnp.array_equal(out, ref))

    # Larger f32 case exercising the multi-chunk concurrent-DMA path.
    k1, k2, k3 = jax.random.split(key, 3)
    x2 = jax.random.normal(k1, (8, 32, 64, 64), dtype=jnp.float32)
    out2 = jax.block_until_ready(pallas_view(x2, (8, -1)))
    assert bool(jnp.array_equal(out2, x2.reshape(8, -1)))

    # bf16 case.
    x3 = jax.random.normal(k2, (2, 3, 16, 16), dtype=jnp.bfloat16)
    out3 = jax.block_until_ready(pallas_view(x3, (-1, 16)))
    assert bool(jnp.array_equal(out3, x3.reshape(-1, 16)))

    # Element count not a multiple of 128 (handled by the same DMA path,
    # no whole-array-VMEM fallback needed).
    x4 = jax.random.normal(k3, (3, 5, 7), dtype=jnp.float32)
    out4 = jax.block_until_ready(pallas_view(x4, (-1,)))
    assert bool(jnp.array_equal(out4, x4.reshape(-1)))

    # Metadata-only short-circuit (the true "view").
    out5 = jax.block_until_ready(pallas_view(x, (2, -1), use_kernel=False))
    assert bool(jnp.array_equal(out5, ref))

    print("KERNEL_OK")
</pallas_src>

<mosaic_0001>
module attributes {stable_mosaic.version = 11 : i64} {
  func.func @kernel(%arg0: memref<1x2048xf32, #tpu.memory_space<any>>, %arg1: memref<1x2048xf32, #tpu.memory_space<any>>, %arg2: memref<1x!tpu.dma_semaphore, #tpu.memory_space<semaphore_mem>>) attributes {dimension_semantics = [], scalar_prefetch = 0 : i64, scratch_operands = 1 : i64, tpu.core_type = #tpu.core_type<tc>} {
    %c0_i32 = arith.constant 0 : i32
    %c0_i32_0 = arith.constant 0 : i32
    %c0_i32_1 = arith.constant 0 : i32
    %c0_i32_2 = arith.constant 0 : i32
    %0 = tpu.memref_slice %arg0[%c0_i32, %c0_i32_2] : memref<1x2048xf32, #tpu.memory_space<any>> -> memref<1x2048xf32, #tpu.memory_space<any>>
    %1 = tpu.memref_squeeze %0 : memref<1x2048xf32, #tpu.memory_space<any>> -> memref<2048xf32, #tpu.memory_space<any>>
    %c0_i32_3 = arith.constant 0 : i32
    %2 = tpu.memref_slice %arg1[%c0_i32_0, %c0_i32_3] : memref<1x2048xf32, #tpu.memory_space<any>> -> memref<1x2048xf32, #tpu.memory_space<any>>
    %3 = tpu.memref_squeeze %2 : memref<1x2048xf32, #tpu.memory_space<any>> -> memref<2048xf32, #tpu.memory_space<any>>
    %4 = tpu.memref_slice %arg2[%c0_i32_1] : memref<1x!tpu.dma_semaphore, #tpu.memory_space<semaphore_mem>> -> memref<1x!tpu.dma_semaphore, #tpu.memory_space<semaphore_mem>>
    %5 = tpu.memref_squeeze %4 : memref<1x!tpu.dma_semaphore, #tpu.memory_space<semaphore_mem>> -> memref<!tpu.dma_semaphore, #tpu.memory_space<semaphore_mem>>
    tpu.enqueue_dma source(%1 : memref<2048xf32, #tpu.memory_space<any>>) target(%3 : memref<2048xf32, #tpu.memory_space<any>>) target_semaphore(%5 : memref<!tpu.dma_semaphore, #tpu.memory_space<semaphore_mem>>)
    %c0_i32_4 = arith.constant 0 : i32
    %c0_i32_5 = arith.constant 0 : i32
    %c0_i32_6 = arith.constant 0 : i32
    %c0_i32_7 = arith.constant 0 : i32
    %6 = tpu.memref_slice %arg0[%c0_i32_4, %c0_i32_7] : memref<1x2048xf32, #tpu.memory_space<any>> -> memref<1x2048xf32, #tpu.memory_space<any>>
    %7 = tpu.memref_squeeze %6 : memref<1x2048xf32, #tpu.memory_space<any>> -> memref<2048xf32, #tpu.memory_space<any>>
    %c0_i32_8 = arith.constant 0 : i32
    %8 = tpu.memref_slice %arg1[%c0_i32_5, %c0_i32_8] : memref<1x2048xf32, #tpu.memory_space<any>> -> memref<1x2048xf32, #tpu.memory_space<any>>
    %9 = tpu.memref_squeeze %8 : memref<1x2048xf32, #tpu.memory_space<any>> -> memref<2048xf32, #tpu.memory_space<any>>
    %10 = tpu.memref_slice %arg2[%c0_i32_6] : memref<1x!tpu.dma_semaphore, #tpu.memory_space<semaphore_mem>> -> memref<1x!tpu.dma_semaphore, #tpu.memory_space<semaphore_mem>>
    %11 = tpu.memref_squeeze %10 : memref<1x!tpu.dma_semaphore, #tpu.memory_space<semaphore_mem>> -> memref<!tpu.dma_semaphore, #tpu.memory_space<semaphore_mem>>
    tpu.wait_dma2 semaphore(%11 : memref<!tpu.dma_semaphore, #tpu.memory_space<semaphore_mem>>) src(%7 : memref<2048xf32, #tpu.memory_space<any>>) dst(%9 : memref<2048xf32, #tpu.memory_space<any>>)
    return
  }
}

</mosaic_0001>

<bundles_post_ra>
// kernel: tpu_custom_call.1
= control target key start
LH: loop header
LB: loop body
LE: loop exit
PB: predicated region body
PF: predicated region fallthrough
CT: control target
= control target key end

     0   :  { %s33_s6 = smov [#allocation2]   ;;  %s34_s7 = smov [#allocation3]   ;;  %s52_s0 = inlined_call_operand.hbm [shape: f32[1,2048], index: 0, kind: input, shape index: {}]   ;;  %s53_s1 = inlined_call_operand.hbm [shape: f32[1,2048], index: 1, kind: output, shape index: {}]  }
   0x1   :  { %s35_s8 = smov 0  }
   0x2   :  { %18 = dma.general %s52_s0, 256, %s53_s1, %s33_s6, %s34_s7, [#allocation4], %s35_s8, 0  }
   0x3   :  { %31 = dma.done.wait [#allocation2], 256 }
   0x4   :  { %32 = vsyncadd [#allocation2], 4294967040 }
   0x5   :  { %21 = vsyncmov [#allocation2] }
   0x8   :  { %s22_s13 = vpop.sfrf %21 }
   0x9   :  { %p27_p0 = scmp.ne.s32.totalorder %s22_s13, 0 }
   0xb   :  { %26 = shalt.err (%p27_p0)  }

</bundles_post_ra>
